<compile_context>
chip_gen: v7x
topology: tpu7x:2x2x1
jax: 0.10.0
libtpu: 0.0.40
codegen_flags: <defaults>
</compile_context>

<pallas_src>
import math
from functools import partial

import jax
import jax.numpy as jnp
from jax import lax
from jax.experimental import pallas as pl
from jax.experimental.pallas import tpu as pltpu

VMEM_LIMIT = 48 * 1024 * 1024   # fits every generation (v5e/v6e/v7x physical >= 64 MiB)
LN_EPS = 1e-6


def _pick_tile(dim, cap, align):
    """Largest tile <= cap that evenly divides dim, preferring multiples of `align`."""
    if dim <= cap:
        return dim
    t = (cap // align) * align
    while t >= align:
        if dim % t == 0:
            return t
        t -= align
    for t in range(cap, 0, -1):
        if dim % t == 0:
            return t
    return dim


def _layernorm_rows(x_f32, gamma, beta, eps):
    """Reference-style LayerNorm: unbiased std (divide by D-1), eps added to std."""
    d = x_f32.shape[-1]
    mean = jnp.mean(x_f32, axis=-1, keepdims=True)
    diff = x_f32 - mean
    var = jnp.sum(diff * diff, axis=-1, keepdims=True) * (1.0 / float(d - 1))
    std = jnp.sqrt(var)
    return gamma * diff / (std + eps) + beta


# ----------------------------------------------------------------------------
# Fused LayerNorm + linear  (x f32 -> LN -> bf16 matmul -> bf16 out)
# ----------------------------------------------------------------------------

def _ln_linear_kernel(x_ref, g_ref, bt_ref, w_ref, b_ref, o_ref, *, eps):
    xn = _layernorm_rows(x_ref[...].astype(jnp.float32), g_ref[...], bt_ref[...], eps)
    y = jnp.dot(xn.astype(jnp.bfloat16), w_ref[...],
                preferred_element_type=jnp.float32) + b_ref[...]
    o_ref[...] = y.astype(o_ref.dtype)


def ln_linear_pallas(x2d, gamma, beta, w_bf16, b, out_dtype=jnp.bfloat16):
    M, D = x2d.shape
    N = w_bf16.shape[1]
    tm = _pick_tile(M, 256, 8)
    tn = _pick_tile(N, 512, 128)
    return pl.pallas_call(
        partial(_ln_linear_kernel, eps=LN_EPS),
        grid=(M // tm, N // tn),
        in_specs=[
            pl.BlockSpec((tm, D), lambda i, n: (i, 0)),
            pl.BlockSpec((1, D), lambda i, n: (0, 0)),
            pl.BlockSpec((1, D), lambda i, n: (0, 0)),
            pl.BlockSpec((D, tn), lambda i, n: (0, n)),
            pl.BlockSpec((1, tn), lambda i, n: (0, n)),
        ],
        out_specs=pl.BlockSpec((tm, tn), lambda i, n: (i, n)),
        out_shape=jax.ShapeDtypeStruct((M, N), out_dtype),
        compiler_params=pltpu.CompilerParams(
            dimension_semantics=("parallel", "parallel"),
            vmem_limit_bytes=VMEM_LIMIT),
        cost_estimate=pl.CostEstimate(
            flops=int(2 * M * N * D), transcendentals=0,
            bytes_accessed=int(M * D * 4 + D * N * 2 + M * N * 2)),
    )(x2d, gamma, beta, w_bf16, b)


# ----------------------------------------------------------------------------
# Plain linear (bf16 in/out) — used for cross-attention K/V projection
# ----------------------------------------------------------------------------

def _linear_kernel(x_ref, w_ref, b_ref, o_ref):
    x = x_ref[...].astype(jnp.bfloat16)
    y = jnp.dot(x, w_ref[...], preferred_element_type=jnp.float32) + b_ref[...]
    o_ref[...] = y.astype(o_ref.dtype)


def linear_pallas(x2d, w_bf16, b, out_dtype=jnp.bfloat16):
    M, K = x2d.shape
    N = w_bf16.shape[1]
    tm = _pick_tile(M, 256, 8)
    tn = _pick_tile(N, 512, 128)
    return pl.pallas_call(
        _linear_kernel,
        grid=(M // tm, N // tn),
        in_specs=[
            pl.BlockSpec((tm, K), lambda i, n: (i, 0)),
            pl.BlockSpec((K, tn), lambda i, n: (0, n)),
            pl.BlockSpec((1, tn), lambda i, n: (0, n)),
        ],
        out_specs=pl.BlockSpec((tm, tn), lambda i, n: (i, n)),
        out_shape=jax.ShapeDtypeStruct((M, N), out_dtype),
        compiler_params=pltpu.CompilerParams(
            dimension_semantics=("parallel", "parallel"),
            vmem_limit_bytes=VMEM_LIMIT),
    )(x2d, w_bf16, b)


# ----------------------------------------------------------------------------
# Linear + fused residual add (attention output projection) -> f32 residual stream
# ----------------------------------------------------------------------------

def _linear_residual_kernel(a_ref, w_ref, b_ref, r_ref, o_ref):
    a = a_ref[...].astype(jnp.bfloat16)
    y = jnp.dot(a, w_ref[...], preferred_element_type=jnp.float32) + b_ref[...]
    o_ref[...] = (r_ref[...].astype(jnp.float32) + y).astype(o_ref.dtype)


def linear_residual_pallas(a2d, w_bf16, b, residual2d):
    M, K = a2d.shape
    N = w_bf16.shape[1]
    tm = _pick_tile(M, 256, 8)
    tn = _pick_tile(N, 512, 128)
    return pl.pallas_call(
        _linear_residual_kernel,
        grid=(M // tm, N // tn),
        in_specs=[
            pl.BlockSpec((tm, K), lambda i, n: (i, 0)),
            pl.BlockSpec((K, tn), lambda i, n: (0, n)),
            pl.BlockSpec((1, tn), lambda i, n: (0, n)),
            pl.BlockSpec((tm, tn), lambda i, n: (i, n)),
        ],
        out_specs=pl.BlockSpec((tm, tn), lambda i, n: (i, n)),
        out_shape=jax.ShapeDtypeStruct((M, N), jnp.float32),
        compiler_params=pltpu.CompilerParams(
            dimension_semantics=("parallel", "parallel"),
            vmem_limit_bytes=VMEM_LIMIT),
    )(a2d, w_bf16, b, residual2d)


# ----------------------------------------------------------------------------
# Fused LayerNorm + FFN (linear1 + ReLU + linear2) + residual
# The (M, d_ff) intermediate never leaves VMEM; LN result cached in VMEM scratch.
# ----------------------------------------------------------------------------

def _ln_ffn_kernel(x_ref, g_ref, bt_ref, w1_ref, b1_ref, w2_ref, b2_ref, o_ref,
                   xn_ref, acc_ref, *, eps):
    @pl.when(pl.program_id(1) == 0)
    def _():
        xn = _layernorm_rows(x_ref[...].astype(jnp.float32), g_ref[...], bt_ref[...], eps)
        xn_ref[...] = xn.astype(jnp.bfloat16)
        acc_ref[...] = jnp.zeros_like(acc_ref)

    h = jnp.dot(xn_ref[...], w1_ref[...], preferred_element_type=jnp.float32)
    h = jnp.maximum(h + b1_ref[...], 0.0)
    acc_ref[...] += jnp.dot(h.astype(jnp.bfloat16), w2_ref[...],
                            preferred_element_type=jnp.float32)

    @pl.when(pl.program_id(1) == pl.num_programs(1) - 1)
    def _():
        o_ref[...] = (x_ref[...].astype(jnp.float32) + acc_ref[...]
                      + b2_ref[...]).astype(o_ref.dtype)


def ln_ffn_residual_pallas(x2d, gamma, beta, w1_bf16, b1, w2_bf16, b2):
    M, D = x2d.shape
    F = w1_bf16.shape[1]
    tm = _pick_tile(M, 256, 8)
    tf = _pick_tile(F, 256, 128)   # keep (tm, tf) f32 intermediate within vreg budget
    return pl.pallas_call(
        partial(_ln_ffn_kernel, eps=LN_EPS),
        grid=(M // tm, F // tf),
        in_specs=[
            pl.BlockSpec((tm, D), lambda i, f: (i, 0)),
            pl.BlockSpec((1, D), lambda i, f: (0, 0)),
            pl.BlockSpec((1, D), lambda i, f: (0, 0)),
            pl.BlockSpec((D, tf), lambda i, f: (0, f)),
            pl.BlockSpec((1, tf), lambda i, f: (0, f)),
            pl.BlockSpec((tf, D), lambda i, f: (f, 0)),
            pl.BlockSpec((1, D), lambda i, f: (0, 0)),
        ],
        out_specs=pl.BlockSpec((tm, D), lambda i, f: (i, 0)),
        out_shape=jax.ShapeDtypeStruct((M, D), jnp.float32),
        scratch_shapes=[pltpu.VMEM((tm, D), jnp.bfloat16),
                        pltpu.VMEM((tm, D), jnp.float32)],
        compiler_params=pltpu.CompilerParams(
            dimension_semantics=("parallel", "arbitrary"),
            vmem_limit_bytes=VMEM_LIMIT),
        cost_estimate=pl.CostEstimate(
            flops=int(4 * M * F * D), transcendentals=0,
            bytes_accessed=int(M * D * 4 + 2 * D * F * 2 + M * D * 4)),
    )(x2d, gamma, beta, w1_bf16, b1, w2_bf16, b2)


# ----------------------------------------------------------------------------
# Attention: one grid step per batch, ALL heads per step, lane-dense (S, D) I/O.
# Mask passed un-broadcast ((B,1,Sk) or (B,Sq,Sk) int8) and broadcast in-kernel.
# ----------------------------------------------------------------------------

def _attention_kernel(q_ref, k_ref, v_ref, m_ref, o_ref, *, num_heads, scale):
    q = q_ref[...]                       # (Sq, D) bf16
    k = k_ref[...]                       # (Sk, D) bf16
    v = v_ref[...]                       # (Sk, D) bf16
    mask = m_ref[...]                    # (Sm, Sk) int8, Sm in {1, Sq}
    d = q.shape[-1]
    hd = d // num_heads
    neg = jnp.float32(-1e9)
    outs = []
    for h in range(num_heads):           # static unrolled loop over heads
        lo, hi = h * hd, (h + 1) * hd
        qh, kh, vh = q[:, lo:hi], k[:, lo:hi], v[:, lo:hi]
        # contract last dims directly (no explicit k.T)
        s = lax.dot_general(qh, kh, (((1,), (1,)), ((), ())),
                            preferred_element_type=jnp.float32) * scale
        s = jnp.where(mask == 0, neg, s)                     # broadcast (Sm,Sk)->(Sq,Sk)
        s = s - jnp.max(s, axis=-1, keepdims=True)
        p = jnp.exp(s)
        p = p * pl.reciprocal(jnp.sum(p, axis=-1, keepdims=True), approx=True)
        outs.append(lax.dot_general(p.astype(vh.dtype), vh, (((1,), (0,)), ((), ())),
                                    preferred_element_type=jnp.float32))
    o_ref[...] = jnp.concatenate(outs, axis=-1).astype(o_ref.dtype)


def attention_pallas(q, k, v, mask_i8, num_heads):
    """q: (B,Sq,D), k/v: (B,Sk,D) bf16, mask: (B,{1|Sq},Sk) int8 -> (B,Sq,D) bf16."""
    B, Sq, D = q.shape
    Sk = k.shape[1]
    Sm = mask_i8.shape[1]
    scale = 1.0 / math.sqrt(D // num_heads)
    # TODO(synk): flash-style online softmax with an "arbitrary" Sk grid axis for long sequences.
    return pl.pallas_call(
        partial(_attention_kernel, num_heads=num_heads, scale=scale),
        grid=(B,),
        in_specs=[
            pl.BlockSpec((None, Sq, D), lambda b: (b, 0, 0)),
            pl.BlockSpec((None, Sk, D), lambda b: (b, 0, 0)),
            pl.BlockSpec((None, Sk, D), lambda b: (b, 0, 0)),
            pl.BlockSpec((None, Sm, Sk), lambda b: (b, 0, 0)),
        ],
        out_specs=pl.BlockSpec((None, Sq, D), lambda b: (b, 0, 0)),
        out_shape=jax.ShapeDtypeStruct((B, Sq, D), jnp.bfloat16),
        compiler_params=pltpu.CompilerParams(
            dimension_semantics=("parallel",), vmem_limit_bytes=VMEM_LIMIT),
    )(q, k, v, mask_i8)


# ----------------------------------------------------------------------------
# Standalone LayerNorm (encoder final norm; emits bf16 for the K/V projections)
# ----------------------------------------------------------------------------

def _layernorm_kernel(x_ref, g_ref, bt_ref, o_ref, *, eps):
    o_ref[...] = _layernorm_rows(x_ref[...].astype(jnp.float32),
                                 g_ref[...], bt_ref[...], eps).astype(o_ref.dtype)


def layernorm_pallas(x2d, gamma, beta, out_dtype=jnp.float32):
    M, D = x2d.shape
    tm = _pick_tile(M, 512, 8)
    return pl.pallas_call(
        partial(_layernorm_kernel, eps=LN_EPS),
        grid=(M // tm,),
        in_specs=[
            pl.BlockSpec((tm, D), lambda i: (i, 0)),
            pl.BlockSpec((1, D), lambda i: (0, 0)),
            pl.BlockSpec((1, D), lambda i: (0, 0)),
        ],
        out_specs=pl.BlockSpec((tm, D), lambda i: (i, 0)),
        out_shape=jax.ShapeDtypeStruct((M, D), out_dtype),
        compiler_params=pltpu.CompilerParams(
            dimension_semantics=("parallel",), vmem_limit_bytes=VMEM_LIMIT),
    )(x2d, gamma, beta)


# ----------------------------------------------------------------------------
# Fused generator: LayerNorm + linear + log-softmax (decoder final norm + Generator)
# ----------------------------------------------------------------------------

def _ln_generator_kernel(x_ref, g_ref, bt_ref, w_ref, b_ref, o_ref, *, eps):
    xn = _layernorm_rows(x_ref[...].astype(jnp.float32), g_ref[...], bt_ref[...], eps)
    logits = jnp.dot(xn.astype(jnp.bfloat16), w_ref[...],
                     preferred_element_type=jnp.float32) + b_ref[...]
    m = jnp.max(logits, axis=-1, keepdims=True)
    shifted = logits - m
    lse = jnp.log(jnp.sum(jnp.exp(shifted), axis=-1, keepdims=True))
    o_ref[...] = (shifted - lse).astype(o_ref.dtype)


def ln_generator_pallas(x2d, gamma, beta, w_bf16, b):
    # TODO(synk): for large vocabularies tile V and use an online logsumexp.
    M, D = x2d.shape
    V = w_bf16.shape[1]
    tm = _pick_tile(M, 256, 8)
    return pl.pallas_call(
        partial(_ln_generator_kernel, eps=LN_EPS),
        grid=(M // tm,),
        in_specs=[
            pl.BlockSpec((tm, D), lambda i: (i, 0)),
            pl.BlockSpec((1, D), lambda i: (0, 0)),
            pl.BlockSpec((1, D), lambda i: (0, 0)),
            pl.BlockSpec((D, V), lambda i: (0, 0)),
            pl.BlockSpec((1, V), lambda i: (0, 0)),
        ],
        out_specs=pl.BlockSpec((tm, V), lambda i: (i, 0)),
        out_shape=jax.ShapeDtypeStruct((M, V), jnp.float32),
        compiler_params=pltpu.CompilerParams(
            dimension_semantics=("parallel",), vmem_limit_bytes=VMEM_LIMIT),
    )(x2d, gamma, beta, w_bf16, b)


# ----------------------------------------------------------------------------
# Model glue (plain JAX: embedding gather, PE add, lane-contiguous QKV slices)
# ----------------------------------------------------------------------------

def self_attn_sublayer(pa, pn, x3d, mask_i8, heads):
    B, S, D = x3d.shape
    x2d = x3d.reshape(-1, D)
    qkv = ln_linear_pallas(x2d, pn["gamma"], pn["beta"], pa["w_qkv"], pa["b_qkv"])   # (M,3D) bf16
    q = qkv[:, :D].reshape(B, S, D)
    k = qkv[:, D:2 * D].reshape(B, S, D)
    v = qkv[:, 2 * D:].reshape(B, S, D)
    a = attention_pallas(q, k, v, mask_i8, heads)                                    # (B,S,D) bf16
    y = linear_residual_pallas(a.reshape(-1, D), pa["wo_w"], pa["wo_b"], x2d)        # f32
    return y.reshape(B, S, D)


def cross_attn_sublayer(pa, pn, x3d, mem_bf16, mask_i8, heads):
    B, Sq, D = x3d.shape
    Sk = mem_bf16.shape[1]
    x2d = x3d.reshape(-1, D)
    q = ln_linear_pallas(x2d, pn["gamma"], pn["beta"], pa["w_q"], pa["b_q"]).reshape(B, Sq, D)
    kv = linear_pallas(mem_bf16.reshape(-1, D), pa["w_kv"], pa["b_kv"])              # (B*Sk,2D) bf16
    k = kv[:, :D].reshape(B, Sk, D)
    v = kv[:, D:].reshape(B, Sk, D)
    a = attention_pallas(q, k, v, mask_i8, heads)
    y = linear_residual_pallas(a.reshape(-1, D), pa["wo_w"], pa["wo_b"], x2d)
    return y.reshape(B, Sq, D)


def ffn_sublayer(pf, pn, x3d):
    B, S, D = x3d.shape
    y = ln_ffn_residual_pallas(x3d.reshape(-1, D), pn["gamma"], pn["beta"],
                               pf["w1"], pf["b1"], pf["w2"], pf["b2"])
    return y.reshape(B, S, D)


def make_positional_encodings(max_len, d_model):
    pos = jnp.arange(max_len, dtype=jnp.float32)[:, None]
    mult = jnp.exp(jnp.arange(0, d_model, 2, dtype=jnp.float32)
                   * -(math.log(10000.0) / d_model))
    pe = jnp.zeros((max_len, d_model), jnp.float32)
    pe = pe.at[:, 0::2].set(jnp.sin(pos * mult))
    pe = pe.at[:, 1::2].set(jnp.cos(pos * mult))
    return pe


def transformer_fwd(params, src, trg, src_mask, trg_mask, d_model, heads):
    src_mask_i8 = (src_mask != 0).astype(jnp.int8)        # (B, 1, S_src)
    trg_mask_i8 = (trg_mask != 0).astype(jnp.int8)        # (B, S_tgt, S_tgt)

    # Encoder
    x = params["enc_embed"][src] * math.sqrt(d_model)
    x = x + params["pe"][None, : x.shape[1], :]
    for lp in params["encoder"]["layers"]:
        x = self_attn_sublayer(lp["attn"], lp["norm0"], x, src_mask_i8, heads)
        x = ffn_sublayer(lp["ffn"], lp["norm1"], x)
    mem = layernorm_pallas(x.reshape(-1, d_model),
                           params["encoder"]["norm"]["gamma"],
                           params["encoder"]["norm"]["beta"],
                           out_dtype=jnp.bfloat16).reshape(x.shape)

    # Decoder
    y = params["dec_embed"][trg] * math.sqrt(d_model)
    y = y + params["pe"][None, : y.shape[1], :]
    for lp in params["decoder"]["layers"]:
        y = self_attn_sublayer(lp["self_attn"], lp["norm0"], y, trg_mask_i8, heads)
        y = cross_attn_sublayer(lp["src_attn"], lp["norm1"], y, mem, src_mask_i8, heads)
        y = ffn_sublayer(lp["ffn"], lp["norm2"], y)

    # Generator (decoder final norm + linear + log-softmax fused)
    B, S, D = y.shape
    out = ln_generator_pallas(y.reshape(-1, D),
                              params["decoder"]["norm"]["gamma"],
                              params["decoder"]["norm"]["beta"],
                              params["gen"]["w"], params["gen"]["b"])
    return out.reshape(B, S, -1)


# ----------------------------------------------------------------------------
# Deterministic parameter init (nn.Linear fan-in uniform); weights stored bf16 once.
# ----------------------------------------------------------------------------

def _uniform(key, shape, fan_in):
    bound = 1.0 / math.sqrt(fan_in)
    return jax.random.uniform(key, shape, jnp.float32, -bound, bound)


def init_linear_wb(key, fan_in, fan_out):
    kw, kb = jax.random.split(key)
    w = _uniform(kw, (fan_in, fan_out), fan_in).astype(jnp.bfloat16)
    b = _uniform(kb, (1, fan_out), fan_in)                  # f32, pre-reshaped
    return w, b


def init_self_attn_p(key, d_model):
    ks = jax.random.split(key, 4)
    wq, bq = init_linear_wb(ks[0], d_model, d_model)
    wk, bk = init_linear_wb(ks[1], d_model, d_model)
    wv, bv = init_linear_wb(ks[2], d_model, d_model)
    wo, bo = init_linear_wb(ks[3], d_model, d_model)
    return {"w_qkv": jnp.concatenate([wq, wk, wv], axis=1),
            "b_qkv": jnp.concatenate([bq, bk, bv], axis=1),
            "wo_w": wo, "wo_b": bo}


def init_cross_attn_p(key, d_model):
    ks = jax.random.split(key, 4)
    wq, bq = init_linear_wb(ks[0], d_model, d_model)
    wk, bk = init_linear_wb(ks[1], d_model, d_model)
    wv, bv = init_linear_wb(ks[2], d_model, d_model)
    wo, bo = init_linear_wb(ks[3], d_model, d_model)
    return {"w_q": wq, "b_q": bq,
            "w_kv": jnp.concatenate([wk, wv], axis=1),
            "b_kv": jnp.concatenate([bk, bv], axis=1),
            "wo_w": wo, "wo_b": bo}


def init_ffn_p(key, d_model, d_ff):
    k1, k2 = jax.random.split(key)
    w1, b1 = init_linear_wb(k1, d_model, d_ff)
    w2, b2 = init_linear_wb(k2, d_ff, d_model)
    return {"w1": w1, "b1": b1, "w2": w2, "b2": b2}


def init_ln_p(d_model):
    return {"gamma": jnp.ones((1, d_model), jnp.float32),
            "beta": jnp.zeros((1, d_model), jnp.float32)}


def init_params(key, src_vocab, trg_vocab, d_model, N, heads, d_ff, max_len):
    keys = jax.random.split(key, 3)
    enc_layers, dec_layers = [], []
    ek = jax.random.split(keys[0], N)
    dk = jax.random.split(keys[1], N)
    for i in range(N):
        ka, kf = jax.random.split(ek[i])
        enc_layers.append({"attn": init_self_attn_p(ka, d_model),
                           "ffn": init_ffn_p(kf, d_model, d_ff),
                           "norm0": init_ln_p(d_model), "norm1": init_ln_p(d_model)})
        ks1, ks2, kf2 = jax.random.split(dk[i], 3)
        dec_layers.append({"self_attn": init_self_attn_p(ks1, d_model),
                           "src_attn": init_cross_attn_p(ks2, d_model),
                           "ffn": init_ffn_p(kf2, d_model, d_ff),
                           "norm0": init_ln_p(d_model), "norm1": init_ln_p(d_model),
                           "norm2": init_ln_p(d_model)})
    k_eemb, k_demb, k_gen = jax.random.split(keys[2], 3)
    gw, gb = init_linear_wb(k_gen, d_model, trg_vocab)
    return {
        "enc_embed": jax.random.normal(k_eemb, (src_vocab, d_model), jnp.float32),
        "dec_embed": jax.random.normal(k_demb, (trg_vocab, d_model), jnp.float32),
        "pe": make_positional_encodings(max_len, d_model),
        "encoder": {"layers": enc_layers, "norm": init_ln_p(d_model)},
        "decoder": {"layers": dec_layers, "norm": init_ln_p(d_model)},
        "gen": {"w": gw, "b": gb},
    }


# ----------------------------------------------------------------------------

if __name__ == "__main__":
    key = jax.random.PRNGKey(0)
    # Lane-friendly small config (feature dims multiples of 128 where it matters).
    src_vocab, trg_vocab = 256, 256
    d_model, N, heads, d_ff = 128, 2, 4, 256
    batch, seq_src, seq_tgt = 2, 8, 8
    max_len = 64

    k_params, k_src, k_trg = jax.random.split(key, 3)
    params = init_params(k_params, src_vocab, trg_vocab, d_model, N, heads, d_ff, max_len)

    src = jax.random.randint(k_src, (batch, seq_src), 0, src_vocab, dtype=jnp.int32)
    trg = jax.random.randint(k_trg, (batch, seq_tgt), 0, trg_vocab, dtype=jnp.int32)
    # encoder mask: (B, 1, seq_src); decoder mask: causal (B, seq_tgt, seq_tgt)
    src_mask = jnp.ones((batch, 1, seq_src), jnp.float32)
    trg_mask = jnp.broadcast_to(
        jnp.tril(jnp.ones((seq_tgt, seq_tgt), jnp.float32))[None], (batch, seq_tgt, seq_tgt)
    )

    out = transformer_fwd(params, src, trg, src_mask, trg_mask, d_model, heads)
    out = jax.block_until_ready(out)
    assert out.shape == (batch, seq_tgt, trg_vocab), out.shape
    assert bool(jnp.isfinite(out).all())
    print("KERNEL_OK")
</pallas_src>

<mosaic_0001>
module attributes {stable_mosaic.version = 11 : i64} {
  func.func @_ln_linear_kernel(%arg0: i32, %arg1: i32, %arg2: memref<16x128xf32, #tpu.memory_space<vmem>>, %arg3: memref<1x128xf32, #tpu.memory_space<vmem>>, %arg4: memref<1x128xf32, #tpu.memory_space<vmem>>, %arg5: memref<128x384xbf16, #tpu.memory_space<vmem>>, %arg6: memref<1x384xf32, #tpu.memory_space<vmem>>, %arg7: memref<16x384xbf16, #tpu.memory_space<vmem>>) attributes {dimension_semantics = [#tpu.dimension_semantics<parallel>, #tpu.dimension_semantics<parallel>], iteration_bounds = array<i64: 1, 1>, scalar_prefetch = 0 : i64, scratch_operands = 0 : i64, tpu.core_type = #tpu.core_type<tc>, window_params = [{transform_indices = @transform_0, window_bounds = array<i64: 16, 128>}, {pipeline_mode = #tpu.pipeline_mode<synchronous>, transform_indices = @transform_1, window_bounds = array<i64: 1, 128>}, {pipeline_mode = #tpu.pipeline_mode<synchronous>, transform_indices = @transform_2, window_bounds = array<i64: 1, 128>}, {transform_indices = @transform_3, window_bounds = array<i64: 128, 384>}, {transform_indices = @transform_4, window_bounds = array<i64: 1, 384>}, {transform_indices = @transform_5, window_bounds = array<i64: 16, 384>}]} {
    %c0 = arith.constant 0 : index
    %c0_0 = arith.constant 0 : index
    %0 = vector.load %arg2[%c0, %c0_0] : memref<16x128xf32, #tpu.memory_space<vmem>>, vector<16x128xf32>
    %c0_1 = arith.constant 0 : index
    %c0_2 = arith.constant 0 : index
    %1 = vector.load %arg3[%c0_1, %c0_2] : memref<1x128xf32, #tpu.memory_space<vmem>>, vector<1x128xf32>
    %c0_3 = arith.constant 0 : index
    %c0_4 = arith.constant 0 : index
    %2 = vector.load %arg4[%c0_3, %c0_4] : memref<1x128xf32, #tpu.memory_space<vmem>>, vector<1x128xf32>
    %cst = arith.constant dense<0.000000e+00> : vector<16xf32>
    %3 = vector.multi_reduction <add>, %0, %cst [1] : vector<16x128xf32> to vector<16xf32>
    %4 = vector.shape_cast %3 : vector<16xf32> to vector<16x1xf32>
    %cst_5 = arith.constant 1.280000e+02 : f32
    %5 = vector.broadcast %cst_5 : f32 to vector<16x1xf32>
    %6 = arith.divf %4, %5 : vector<16x1xf32>
    %7 = vector.broadcast %6 : vector<16x1xf32> to vector<16x128xf32>
    %8 = arith.subf %0, %7 : vector<16x128xf32>
    %9 = arith.mulf %8, %8 : vector<16x128xf32>
    %cst_6 = arith.constant dense<0.000000e+00> : vector<16xf32>
    %10 = vector.multi_reduction <add>, %9, %cst_6 [1] : vector<16x128xf32> to vector<16xf32>
    %11 = vector.shape_cast %10 : vector<16xf32> to vector<16x1xf32>
    %cst_7 = arith.constant 0.00787401571 : f32
    %12 = vector.broadcast %cst_7 : f32 to vector<16x1xf32>
    %13 = arith.mulf %11, %12 : vector<16x1xf32>
    %14 = math.sqrt %13 : vector<16x1xf32>
    %15 = vector.broadcast %1 : vector<1x128xf32> to vector<16x128xf32>
    %16 = arith.mulf %15, %8 : vector<16x128xf32>
    %cst_8 = arith.constant 9.99999997E-7 : f32
    %17 = vector.broadcast %cst_8 : f32 to vector<16x1xf32>
    %18 = arith.addf %14, %17 : vector<16x1xf32>
    %19 = vector.broadcast %18 : vector<16x1xf32> to vector<16x128xf32>
    %20 = arith.divf %16, %19 : vector<16x128xf32>
    %21 = vector.broadcast %2 : vector<1x128xf32> to vector<16x128xf32>
    %22 = arith.addf %20, %21 : vector<16x128xf32>
    %23 = arith.truncf %22 : vector<16x128xf32> to vector<16x128xbf16>
    %c0_9 = arith.constant 0 : index
    %c0_10 = arith.constant 0 : index
    %24 = vector.load %arg5[%c0_9, %c0_10] : memref<128x384xbf16, #tpu.memory_space<vmem>>, vector<128x384xbf16>
    %cst_11 = arith.constant dense<0.000000e+00> : vector<16x384xf32>
    %25 = tpu.matmul %23, %24, %cst_11 {dimension_numbers = #tpu.dot_dimension_numbers<[1], [0], [0], [1], [0, 0, 1, 1], [], []>} : vector<16x128xbf16>, vector<128x384xbf16>, vector<16x384xf32> -> vector<16x384xf32>
    %c0_12 = arith.constant 0 : index
    %c0_13 = arith.constant 0 : index
    %26 = vector.load %arg6[%c0_12, %c0_13] : memref<1x384xf32, #tpu.memory_space<vmem>>, vector<1x384xf32>
    %27 = vector.broadcast %26 : vector<1x384xf32> to vector<16x384xf32>
    %28 = arith.addf %25, %27 : vector<16x384xf32>
    %29 = arith.truncf %28 : vector<16x384xf32> to vector<16x384xbf16>
    %c0_14 = arith.constant 0 : index
    %c0_15 = arith.constant 0 : index
    %30 = vector.load %arg7[%c0_14, %c0_15] : memref<16x384xbf16, #tpu.memory_space<vmem>>, vector<16x384xbf16>
    tpu.vector_store %arg7[%c0_14, %c0_15], %29 {strides = array<i32>} : memref<16x384xbf16, #tpu.memory_space<vmem>>, vector<16x384xbf16>,
    return
  }
  func.func @transform_0(%arg0: i32, %arg1: i32) -> (i32, i32) {
    %c0_i32 = arith.constant 0 : i32
    %c0_i32_0 = arith.constant 0 : i32
    return %arg0, %c0_i32 : i32, i32
  }
  func.func @transform_1(%arg0: i32, %arg1: i32) -> (i32, i32) {
    %c0_i32 = arith.constant 0 : i32
    %c0_i32_0 = arith.constant 0 : i32
    %c0_i32_1 = arith.constant 0 : i32
    return %c0_i32, %c0_i32_0 : i32, i32
  }
  func.func @transform_2(%arg0: i32, %arg1: i32) -> (i32, i32) {
    %c0_i32 = arith.constant 0 : i32
    %c0_i32_0 = arith.constant 0 : i32
    %c0_i32_1 = arith.constant 0 : i32
    return %c0_i32, %c0_i32_0 : i32, i32
  }
  func.func @transform_3(%arg0: i32, %arg1: i32) -> (i32, i32) {
    %c0_i32 = arith.constant 0 : i32
    %c0_i32_0 = arith.constant 0 : i32
    return %c0_i32, %arg1 : i32, i32
  }
  func.func @transform_4(%arg0: i32, %arg1: i32) -> (i32, i32) {
    %c0_i32 = arith.constant 0 : i32
    %c0_i32_0 = arith.constant 0 : i32
    return %c0_i32, %arg1 : i32, i32
  }
  func.func @transform_5(%arg0: i32, %arg1: i32) -> (i32, i32) {
    %c0_i32 = arith.constant 0 : i32
    return %arg0, %arg1 : i32, i32
  }
}

</mosaic_0001>

<bundles_post_ra>
// kernel: tpu_custom_call.1
= control target key start
LH: loop header
LB: loop body
LE: loop exit
PB: predicated region body
PF: predicated region fallthrough
CT: control target
= control target key end

     0   :  { %10 = vsyncpa [#allocation3], 0  ;;  %s697_s0 = inlined_call_operand.hbm [shape: f32[16,128], index: 0, kind: input, shape index: {}]   ;;  %s698_s1 = inlined_call_operand.vmem [shape: f32[1,128], index: 1, kind: input, shape index: {}]   ;;  %s699_s2 = inlined_call_operand.vmem [shape: f32[1,128], index: 2, kind: input, shape index: {}]   ;;  %s700_s3 = inlined_call_operand.hbm [shape: bf16[128,384], index: 3, kind: input, shape index: {}]   ;;  %s701_s4 = inlined_call_operand.vmem [shape: f32[1,384], index: 4, kind: input, shape index: {}]   ;;  %s702_s5 = inlined_call_operand.hbm [shape: bf16[16,384], index: 5, kind: output, shape index: {}]  }
   0x1   :  { %11 = vsyncpa [#allocation6], 0 }
   0x2   :  { %12 = vsyncpa [#allocation4], 0  ;;  %s596_s18 = smov [#allocation2]   ;;  %s524_s22 = scalar_lea.hbm %s697_s0, 256 }
   0x3   :  { %s18_s19 = sshll.u32 %s596_s18, 4  ;;  %p525_p0 = scmp.ne.s32.totalorder %s697_s0, %s524_s22  ;;  %s19_s19 = int_to_ptr.vmem [resolvable:$true] %s18_s19 }
   0x4   :  { %p528_p1 = scmp.lt.u32.totalorder %s524_s22, %s697_s0 }
   0x6   :  { %p530_p2 = pnand %p528_p1, %p525_p0 }
   0x8   :  { %533 = shalt.err (!%p530_p2)
}
   0x9   :  { %s534_s27 = scalar_lea.vmem %s19_s19, 256  ;;  %p539_p4 = scmp.lt.s32.totalorder %s19_s19, %s19_s19 }
   0xa   :  { %p535_p3 = scmp.ne.s32.totalorder %s19_s19, %s534_s27  ;;  %p540_p5 = scmp.lt.s32.totalorder %s534_s27, %s534_s27 }
   0xc   :  { %p541_p6 = por %p540_p5, %p539_p4 }
   0xe   :  { %p542_p7 = pnand %p541_p6, %p535_p3 }
  0x10   :  { %545 = shalt.err (!%p542_p7)
}
  0x11   :  { %s597_s28 = smov 128   ;;  %s598_s29 = smov 8  }
  0x12   :  { %24 = dma.hbm_to_vmem [thread:$0]  %s697_s0, 256, %s19_s19, [#allocation3], %s597_s28, %s597_s28, %s598_s29  }
  0x13   :  { %s599_s7 = smov [#allocation5]   ;;  %s546_s11 = scalar_lea.hbm %s700_s3, 3072 }
  0x14   :  { %s34_s8 = sshll.u32 %s599_s7, 4  ;;  %p547_p8 = scmp.ne.s32.totalorder %s700_s3, %s546_s11  ;;  %s35_s8 = int_to_ptr.vmem [resolvable:$true] %s34_s8 }
  0x15   :  { %p550_p9 = scmp.lt.u32.totalorder %s546_s11, %s700_s3 }
  0x17   :  { %p552_p10 = pnand %p550_p9, %p547_p8 }
  0x19   :  { %555 = shalt.err (!%p552_p10)
}
  0x1a   :  { %s556_s16 = scalar_lea.vmem %s35_s8, 3072  ;;  %p561_p12 = scmp.lt.s32.totalorder %s35_s8, %s35_s8 }
  0x1b   :  { %p557_p11 = scmp.ne.s32.totalorder %s35_s8, %s556_s16  ;;  %p562_p13 = scmp.lt.s32.totalorder %s556_s16, %s556_s16 }
  0x1d   :  { %p563_p0 = por %p562_p13, %p561_p12 }
  0x1f   :  { %p564_p1 = pnand %p563_p0, %p557_p11 }
  0x21   :  { %567 = shalt.err (!%p564_p1)
}
  0x22   :  { %s600_s0 = smov 192   ;;  %s601_s17 = smov 12  }
  0x23   :  { %40 = dma.hbm_to_vmem [thread:$0]  %s700_s3, 3072, %s35_s8, [#allocation6], %s600_s0, %s600_s0, %s601_s17  }
  0x24   :  { %590 = dma.done.wait [#allocation3], 256  }
  0x25   :  { %591 = vsyncadd [#allocation3], 4294967040 }
  0x26   :  { %592 = dma.done.wait [#allocation6], 3072  }
  0x27   :  { %593 = vsyncadd [#allocation6], 4294964224  ;;  %v50_v0 = vld [vmem:[#allocation2] sm:$0xff]  ;;  %v51_v1 = vld [vmem:[#allocation2 + $0x8] sm:$0xff]  ;;  %v602_v13 = vmov 0.0   ;;  %v603_v27 = vmov 0   ;;  %v142_v63 = vlaneseq }
  0x28   :  { %54 = vadd.xlane.f32.xlu0 %v50_v0  ;;  %v484_v10 = vld [vmem:[#allocation5 + $0x4] ss:$12 sps:$4 sm:$0xff]   ;;  %v486_v11 = vld [vmem:[#allocation5] ss:$12 sps:$4 sm:$0xff]   ;;  %v487_v12 = vld [vmem:[#allocation5 + $0x8] ss:$12 sps:$4 sm:$0xff]   ;;  %454 = vmatprep.subr.bf16.mxu1 %v602_v13 }
  0x29   :  { %285 = vmatprep.subr.bf16.mxu0 %v484_v10  ;;  %455 = vmatpush3.bf16.msra.mxu1 %v487_v12  ;;  %v488_v14 = vld [vmem:[#allocation5 + $0x1c] ss:$12 sps:$4 sm:$0xff]   ;;  %v490_v15 = vld [vmem:[#allocation5 + $0x18] ss:$12 sps:$4 sm:$0xff]   ;;  %v491_v16 = vld [vmem:[#allocation5 + $0x20] ss:$12 sps:$4 sm:$0xff]  }
  0x2a   :  { %286 = vmatpush1.bf16.msra.mxu0 %v486_v11  ;;  %456 = vmatprep.subr.bf16.mxu1 %v602_v13  ;;  %v492_v17 = vld [vmem:[#allocation5 + $0x34] ss:$12 sps:$4 sm:$0xff]   ;;  %v494_v18 = vld [vmem:[#allocation5 + $0x30] ss:$12 sps:$4 sm:$0xff]   ;;  %v495_v19 = vld [vmem:[#allocation5 + $0x38] ss:$12 sps:$4 sm:$0xff]  }
  0x2b   :  { %287 = vmatprep.subr.bf16.mxu0 %v488_v14  ;;  %v496_v20 = vld [vmem:[#allocation5 + $0x4c] ss:$12 sps:$4 sm:$0xff]   ;;  %v498_v21 = vld [vmem:[#allocation5 + $0x48] ss:$12 sps:$4 sm:$0xff]   ;;  %v499_v22 = vld [vmem:[#allocation5 + $0x50] ss:$12 sps:$4 sm:$0xff]   ;;  %317 = vmatprep.mubr.bf16.mxu0 %v603_v27 }
  0x2c   :  { %56 = vadd.xlane.f32.xlu0 %v51_v1  ;;  %v500_v23 = vld [vmem:[#allocation5 + $0x64] ss:$12 sps:$4 sm:$0xff]   ;;  %v502_v24 = vld [vmem:[#allocation5 + $0x60] ss:$12 sps:$4 sm:$0xff]   ;;  %v503_v25 = vld [vmem:[#allocation5 + $0x68] ss:$12 sps:$4 sm:$0xff]  }
  0x2d   :  { %457 = vmatpush3.bf16.msra.mxu1 %v491_v16  ;;  %v504_v26 = vld [vmem:[#allocation5 + $0x7c] ss:$12 sps:$4 sm:$0xff]   ;;  %vm604_vm0 = vmmov 0   ;;  %v506_v28 = vld [vmem:[#allocation5 + $0x78] ss:$12 sps:$4 sm:$0xff]  }
  0x2e   :  { %288 = vmatpush1.bf16.msra.mxu0 %v490_v15  ;;  %458 = vmatprep.subr.bf16.mxu1 %v602_v13  ;;  %v507_v29 = vld [vmem:[#allocation5 + $0x80] ss:$12 sps:$4 sm:$0xff]   ;;  %v510_v31 = vld [vmem:[#allocation5 + $0x90] ss:$12 sps:$4 sm:$0xff]   ;;  %v511_v32 = vld [vmem:[#allocation5 + $0x98] ss:$12 sps:$4 sm:$0xff]  }
  0x2f   :  { %289 = vmatprep.subr.bf16.mxu0 %v492_v17  ;;  %470 = vmatprep.mubr.msk.bf16.mxu1 %vm604_vm0, %v602_v13  ;;  %v508_v30 = vld [vmem:[#allocation5 + $0x94] ss:$12 sps:$4 sm:$0xff]   ;;  %v512_v33 = vld [vmem:[#allocation5 + $0xac] ss:$12 sps:$4 sm:$0xff]   ;;  %v515_v35 = vld [vmem:[#allocation5 + $0xb0] ss:$12 sps:$4 sm:$0xff]  }
  0x30   :  { %v514_v34 = vld [vmem:[#allocation5 + $0xa8] ss:$12 sps:$4 sm:$0xff]   ;;  %v411_v52 = vld [vmem:[%s698_s1] ss:$0 sm:$0xff] }
  0x31   :  { %459 = vmatpush3.bf16.msra.mxu1 %v495_v19  ;;  %v412_v58 = vld [vmem:[%s699_s2] ss:$0 sm:$0xff]  ;;  %s605_s2 = smov [#allocation7]  }
  0x32   :  { %290 = vmatpush1.bf16.msra.mxu0 %v494_v18  ;;  %460 = vmatprep.subr.bf16.mxu1 %v602_v13 }
  0x33   :  { %291 = vmatprep.subr.bf16.mxu0 %v496_v20 }
  0x35   :  { %461 = vmatpush3.bf16.msra.mxu1 %v499_v22 }
  0x36   :  { %292 = vmatpush1.bf16.msra.mxu0 %v498_v21  ;;  %462 = vmatprep.subr.bf16.mxu1 %v602_v13 }
  0x37   :  { %293 = vmatprep.subr.bf16.mxu0 %v500_v23 }
  0x39   :  { %463 = vmatpush3.bf16.msra.mxu1 %v503_v25 }
  0x3a   :  { %294 = vmatpush1.bf16.msra.mxu0 %v502_v24  ;;  %464 = vmatprep.subr.bf16.mxu1 %v602_v13 }
  0x3b   :  { %295 = vmatprep.subr.bf16.mxu0 %v504_v26 }
  0x3d   :  { %465 = vmatpush3.bf16.msra.mxu1 %v507_v29 }
  0x3e   :  { %296 = vmatpush1.bf16.msra.mxu0 %v506_v28  ;;  %466 = vmatprep.subr.bf16.mxu1 %v602_v13 }
  0x3f   :  { %297 = vmatprep.subr.bf16.mxu0 %v508_v30 }
  0x41   :  { %467 = vmatpush3.bf16.msra.mxu1 %v511_v32 }
  0x42   :  { %298 = vmatpush1.bf16.msra.mxu0 %v510_v31  ;;  %468 = vmatprep.subr.bf16.mxu1 %v602_v13 }
  0x43   :  { %299 = vmatprep.subr.bf16.mxu0 %v512_v33 }
  0x45   :  { %469 = vmatpush3.bf16.msra.mxu1 %v515_v35 }
  0x46   :  { %300 = vmatpush1.bf16.msra.mxu0 %v514_v34 }
  0xb5   :  { %v55_v2 = vpop.xlane.xlu0 %54 }
  0xb6   :  { %v59_v3 = vmul.f32 0.0078125, %v55_v2 }
  0xb8   :  { %v663_v4 = vsub.f32 %v50_v0, %v59_v3  ;;  %v143_v0 = vshrl.u32 %v142_v63, 7  ;;  %v140_v3 = vld [vmem:[%s701_s4] sm:$0x7]  ;;  %s398_s4 = sshll.u32 %s605_s2, 4  ;;  %s399_s4 = int_to_ptr.vmem [resolvable:$true] %s398_s4 }
  0xb9   :  { %v57_v5 = vpop.xlane.xlu0 %56  ;;  %s568_s24 = scalar_lea.vmem %s399_s4, 384  ;;  %p573_p3 = scmp.lt.s32.totalorder %s399_s4, %s399_s4 }
  0xba   :  { %v60_v6 = vmul.f32 0.0078125, %v57_v5  ;;  %v63_v7 = vmul.f32 %v663_v4, %v663_v4  ;;  %v91_v54 = vmul.f32 %v411_v52, %v663_v4  ;;  %v152_v2 = vsub.s32 2, %v143_v0  ;;  %p569_p2 = scmp.ne.s32.totalorder %s399_s4, %s568_s24  ;;  %p574_p4 = scmp.lt.s32.totalorder %s568_s24, %s568_s24 }
  0xbb   :  { %v148_v4 = vsub.s32 1, %v143_v0 }
  0xbc   :  { %v667_v8 = vsub.f32 %v51_v1, %v60_v6  ;;  %65 = vadd.xlane.f32.xlu1 %v63_v7  ;;  %v144_v1 = vsub.s32 0, %v143_v0  ;;  %v153_v6 = vrot.slane %v140_v3, %v152_v2  ;;  %p575_p5 = por %p574_p4, %p573_p3 }
  0xbd   :  { %v149_v7 = vrot.slane %v140_v3, %v148_v4 }
  0xbe   :  { %v64_v9 = vmul.f32 %v667_v8, %v667_v8  ;;  %v92_v55 = vmul.f32 %v411_v52, %v667_v8  ;;  %v145_v5 = vrot.slane %v140_v3, %v144_v1  ;;  %p576_p6 = pnand %p575_p5, %p569_p2 }
  0xc0   :  { %67 = vadd.xlane.f32.xlu1 %v64_v9 }
 0x149   :  { %v66_v36 = vpop.xlane.xlu1 %65 }
 0x14a   :  { %v69_v37 = vmul.f32 0.007874016, %v66_v36 }
 0x14c   :  { %516 = vrsqrt.f32 %v69_v37  ;;  %vm73_vm1 = vcmp.eq.f32.partialorder %v69_v37, inf  ;;  %v76_v42 = vand.u32 2147483648, %v69_v37  ;;  %vm75_vm2 = vcmp.eq.f32.partialorder %v69_v37, 0.0 }
 0x14d   :  { %v68_v38 = vpop.xlane.xlu1 %67 }
 0x14e   :  { %v70_v39 = vmul.f32 0.007874016, %v68_v38 }
 0x150   :  { %518 = vrsqrt.f32 %v70_v39  ;;  %vm80_vm3 = vcmp.eq.f32.partialorder %v70_v39, inf  ;;  %v83_v48 = vand.u32 2147483648, %v70_v39  ;;  %vm82_vm4 = vcmp.eq.f32.partialorder %v70_v39, 0.0 }
 0x156   :  { %v517_v40 = vpop.eup %516 }
 0x157   :  { %v72_v41 = vmul.f32 %v517_v40, %v69_v37 }
 0x159   :  { %v74_v43 = vsel %vm73_vm1, %v69_v37, %v72_v41 }
 0x15a   :  { %v519_v44 = vpop.eup %518  ;;  %v77_v45 = vsel %vm75_vm2, %v76_v42, %v74_v43 }
 0x15b   :  { %v79_v46 = vmul.f32 %v519_v44, %v70_v39  ;;  %v93_v47 = vadd.f32 1e-06, %v77_v45 }
 0x15d   :  { %v81_v49 = vsel %vm80_vm3, %v70_v39, %v79_v46  ;;  %520 = vrcp.f32 %v93_v47 }
 0x15e   :  { %v84_v50 = vsel %vm82_vm4, %v83_v48, %v81_v49 }
 0x15f   :  { %v94_v51 = vadd.f32 1e-06, %v84_v50 }
 0x161   :  { %522 = vrcp.f32 %v94_v51 }
 0x167   :  { %v521_v53 = vpop.eup %520 }
 0x168   :  { %v96_v56 = vmul.f32 %v521_v53, %v91_v54 }
 0x16a   :  { %v105_v60 = vadd.f32 %v412_v58, %v96_v56 }
 0x16b   :  { %v523_v57 = vpop.eup %522 }
 0x16c   :  { %v98_v59 = vmul.f32 %v523_v57, %v92_v55 }
 0x16e   :  { %v106_v61 = vadd.f32 %v412_v58, %v98_v59 }
 0x170   :  { %v107_v62 = vpack.c.bf16 %v106_v61, %v105_v60 }
 0x172   :  { %318 = vmatmul.mubr.bf16.vlgmr.msra.gmra.mrb[0].mxu0 %v107_v62  ;;  %471 = vmatmul.mubr.bf16.vlgmr.msra.gmra.mrb[0].mxu1 %v107_v62 }
 0x245   :  { %v319_v8 = vpop.f32.mrb[0].mxu0  ;;  %v362_v9 = vpop.f32.mrb[0].mxu1 }
 0x246   :  { %v320_v10 = vadd.f32 %v319_v8, %v145_v5  ;;  %v363_v11 = vadd.f32 %v362_v9, %v153_v6  ;;  %v321_v12 = vpop.f32.mrb[1].mxu0  ;;  %v472_v13 = vpop.f32.mrb[1].mxu1 }
 0x247   :  { %v322_v14 = vadd.f32 %v321_v12, %v149_v7  ;;  %v323_v15 = vpop.f32.mrb[2].mxu0  ;;  %v365_v16 = vpop.f32.mrb[2].mxu1 }
 0x248   :  { %v442_v17 = vpack.c.bf16 %v363_v11, %v363_v11  ;;  %v324_v18 = vadd.f32 %v323_v15, %v145_v5  ;;  %v366_v19 = vadd.f32 %v365_v16, %v153_v6  ;;  %v325_v20 = vpop.f32.mrb[3].mxu0  ;;  %v473_v21 = vpop.f32.mrb[3].mxu1 }
 0x249   :  { %v441_v22 = vpack.c.bf16 %v322_v14, %v320_v10  ;;  %v326_v23 = vadd.f32 %v325_v20, %v149_v7 }
 0x24a   :  { %390 = vst [vmem:[#allocation7 + $0x8] sm:$0xf] %v442_v17  ;;  %v444_v24 = vpack.c.bf16 %v366_v19, %v366_v19 }
 0x24b   :  { %389 = vst [vmem:[#allocation7] sm:$0xff] %v441_v22  ;;  %v443_v25 = vpack.c.bf16 %v326_v23, %v324_v18 }
 0x24c   :  { %392 = vst [vmem:[#allocation7 + $0x14] sm:$0xf] %v444_v24 }
 0x24d   :  { %391 = vst [vmem:[#allocation7 + $0xc] sm:$0xff] %v443_v25 }
 0x24e   :  { %579 = shalt.err (!%p576_p6)
}
 0x24f   :  { %s580_s27 = scalar_lea.hbm %s702_s5, 384 }
 0x250   :  { %p581_p7 = scmp.ne.s32.totalorder %s702_s5, %s580_s27  ;;  %p584_p8 = scmp.lt.u32.totalorder %s580_s27, %s702_s5 }
 0x252   :  { %p586_p9 = pnand %p584_p8, %p581_p7 }
 0x254   :  { %589 = shalt.err (!%p586_p9)
}
 0x255   :  { %404 = dma.vmem_to_hbm [thread:$0]  %s399_s4, 384, %s702_s5, [#allocation4], %s600_s0, %s600_s0, %s601_s17  }
 0x256   :  { %594 = dma.done.wait [#allocation4], 384  }
 0x257   :  { %595 = vsyncadd [#allocation4], 4294966912 }
 0x258   :  { %408 = vsyncpa [#allocation3], 1 }
 0x259   :  { %409 = vsyncpa [#allocation6], 1 }
 0x25a   :  { %410 = vsyncpa [#allocation4], 1 }

</bundles_post_ra>
